<compile_context>
chip_gen: v5e
topology: v5e:2x2
jax: 0.10.0
libtpu: 0.0.40
codegen_flags: <defaults>
</compile_context>

<pallas_src>
import functools

import jax
import jax.numpy as jnp
from jax.experimental import pallas as pl
from jax.experimental.pallas import tpu as pltpu


def _cdiv(a: int, b: int) -> int:
    return -(-a // b)


def _round_up(x: int, m: int) -> int:
    return _cdiv(x, m) * m


def _cd_pair_kernel(s_ref, t_ref, o_ref, *, true_cols: int, tc: int,
                    mask_cols: bool):
    """Accumulate lane-dense (TR, 128) partial sums of (s - t) across col tiles."""
    k = pl.program_id(1)

    @pl.when(k == 0)
    def _init():
        o_ref[...] = jnp.zeros_like(o_ref)

    d = s_ref[...].astype(jnp.float32) - t_ref[...].astype(jnp.float32)
    tr_blk, tc_blk = d.shape  # static block extents

    if mask_cols:
        # Ragged trailing col block: zero out columns past the true extent.
        col_ids = jax.lax.broadcasted_iota(jnp.int32, (tr_blk, tc_blk), 1) + k * tc
        d = jnp.where(col_ids < true_cols, d, 0.0)

    # Fold this tile's columns into 128 lane-partial sums using tile-aligned
    # 128-wide slices + VALU adds (no cross-lane XLU reduce in the k loop).
    n_full = tc_blk // 128
    rem = tc_blk - n_full * 128
    if n_full > 0:
        part = d[:, 0:128]
        for j in range(1, n_full):
            part = part + d[:, j * 128:(j + 1) * 128]
    else:
        part = jnp.zeros((tr_blk, 128), jnp.float32)
    if rem:
        # Only reachable when the whole spatial extent fits one block
        # (tc == cols, single reduction step): one cross-lane reduce of the
        # ragged tail, deposited into lane 0.
        tail = jnp.sum(d[:, n_full * 128:], axis=-1, keepdims=True)  # (TR, 1)
        lane = jax.lax.broadcasted_iota(jnp.int32, (tr_blk, 128), 1)
        part = part + jnp.where(lane == 0, tail, 0.0)

    o_ref[...] += part


def _default_targets():
    """Per-chip tile targets: (tr_target, tc_target, vmem_limit_bytes)."""
    kind = ""
    try:
        kind = jax.devices()[0].device_kind.lower()
    except Exception:
        pass
    if ("v6" in kind) or ("v7" in kind):
        # Bigger steps to amortize ~0.35us/step against fast HBM; 32 MiB
        # f32 pipeline footprint -> raise scoped VMEM to 48 MiB (fits v7x's
        # 64 MiB physical VMEM with headroom).
        return 512, 4096, 48 * 1024 * 1024
    # v5e (16 MiB default scoped VMEM) and older chips: 8 MiB footprint,
    # no scoped-VMEM override needed.
    return 256, 2048, None


def cd_loss_pair_pallas(s_nchw, t_nchw, *, tr_target=None, tc_target=None,
                        vmem_limit_bytes=None):
    """Per-pair CD loss: mean over (N,C) of squared difference of spatial means."""
    assert s_nchw.shape == t_nchw.shape
    n, c, h, w = s_nchw.shape
    rows, cols = n * c, h * w
    s2 = s_nchw.reshape(rows, cols)
    t2 = t_nchw.reshape(rows, cols)

    d_tr, d_tc, d_vmem = _default_targets()
    tr_target = d_tr if tr_target is None else int(tr_target)
    tc_target = max(128, d_tc if tc_target is None else int(tc_target))
    vmem_limit_bytes = d_vmem if vmem_limit_bytes is None else vmem_limit_bytes

    # Sublane multiple for the row (second-minor) axis of the *input* blocks:
    # 8 for 4-byte, 16 for 2-byte (bf16), 32 for 1-byte dtypes.
    sub = max(8, 32 // min(s2.dtype.itemsize, t2.dtype.itemsize))
    tr_target = max(sub, tr_target)

    # Row tiling ("parallel" axis). Guarantee >= 2 row tiles whenever rows
    # allows it so v7x's two TensorCores both get work.
    if rows >= 2 * sub:
        n_rt = max(2, _cdiv(rows, tr_target))
        tr = _round_up(_cdiv(rows, n_rt), sub)
        n_rt = _cdiv(rows, tr)
    else:
        n_rt, tr = 1, rows          # full row extent -> exempt from the 8-rule
    out_rows = n_rt * tr

    # Col tiling ("arbitrary" reduction axis, innermost). No input padding:
    # either one full-extent block, or 128-multiple tiles + in-kernel masking.
    if cols <= tc_target:
        n_ct, tc = 1, cols          # full col extent -> exempt from the 128-rule
        mask_cols = False
    else:
        n_ct = _cdiv(cols, tc_target)
        tc = _round_up(_cdiv(cols, n_ct), 128)
        n_ct = _cdiv(cols, tc)
        mask_cols = (cols % tc) != 0

    kernel = functools.partial(_cd_pair_kernel, true_cols=cols, tc=tc,
                               mask_cols=mask_cols)

    cp_kwargs = dict(dimension_semantics=("parallel", "arbitrary"))
    if vmem_limit_bytes is not None:
        cp_kwargs["vmem_limit_bytes"] = int(vmem_limit_bytes)

    in_bytes = rows * cols * (s2.dtype.itemsize + t2.dtype.itemsize)
    partials = pl.pallas_call(
        kernel,
        out_shape=jax.ShapeDtypeStruct((out_rows, 128), jnp.float32),
        grid_spec=pltpu.PrefetchScalarGridSpec(
            num_scalar_prefetch=0,
            grid=(n_rt, n_ct),                       # reduction axis innermost
            in_specs=[
                pl.BlockSpec((tr, tc), lambda i, k: (i, k)),
                pl.BlockSpec((tr, tc), lambda i, k: (i, k)),
            ],
            out_specs=pl.BlockSpec((tr, 128), lambda i, k: (i, 0)),
        ),
        compiler_params=pltpu.CompilerParams(**cp_kwargs),
        cost_estimate=pl.CostEstimate(
            flops=2 * rows * cols,
            transcendentals=0,
            bytes_accessed=in_bytes + out_rows * 128 * 4,
        ),
    )(s2, t2)

    # Trailing partial row blocks contain unspecified data -> slice them off
    # BEFORE reducing, then finish the tiny (rows,)-sized math in plain JAX.
    row_sums = jnp.sum(partials[:rows], axis=-1)          # (rows,)
    means = row_sums * jnp.float32(1.0 / cols)            # per-row spatial mean diff
    return jnp.sum(means * means) / jnp.float32(rows)


def _cd_loss_pair_ref(s, t):
    """Plain-JAX path (used for tiny feature maps where launch cost dominates)."""
    sm = jnp.mean(s.astype(jnp.float32), axis=(2, 3))
    tm = jnp.mean(t.astype(jnp.float32), axis=(2, 3))
    return jnp.mean((sm - tm) ** 2)


# Below ~256 KiB of input per pair, XLA's fused reduction beats the kernel's
# fixed launch/pipeline-prologue cost.
_PALLAS_MIN_BYTES = 256 * 1024


def cd_loss(stu_features, tea_features, *, min_pallas_bytes=_PALLAS_MIN_BYTES):
    """CDLoss.forward: sum of per-pair losses over the feature list."""
    # TODO(synk): batching several mid-size pairs into one pallas_call (shared
    # row axis via scalar-prefetched offsets) would amortize launch overhead.
    loss = jnp.float32(0.0)
    for s, t in zip(stu_features, tea_features):
        assert s.shape == t.shape
        pair_bytes = s.size * s.dtype.itemsize + t.size * t.dtype.itemsize
        if pair_bytes >= min_pallas_bytes:
            loss = loss + cd_loss_pair_pallas(s, t)
        else:
            loss = loss + _cd_loss_pair_ref(s, t)
    return loss


def _reference(stu_features, tea_features):
    loss = 0.0
    for s, t in zip(stu_features, tea_features):
        sm = jnp.mean(s.astype(jnp.float32), axis=(2, 3))
        tm = jnp.mean(t.astype(jnp.float32), axis=(2, 3))
        loss = loss + jnp.mean((sm - tm) ** 2)
    return loss


if __name__ == "__main__":
    key = jax.random.PRNGKey(0)
    # Small feature pairs covering: lane-aligned spatial, ragged spatial
    # (tail < 128), spatial narrower than one lane tile, a ragged row count
    # (2 row tiles with a partial trailing block), and a bf16 stream.
    shapes_dtypes = [
        ((2, 4, 16, 16), jnp.float32),   # cols=256 (2 full lane chunks)
        ((2, 4, 14, 14), jnp.float32),   # cols=196 (128 + 68 tail)
        ((2, 8, 8, 8), jnp.float32),     # cols=64 (< one lane tile), rows=16 -> 2 row tiles
        ((3, 11, 8, 8), jnp.float32),    # rows=33 -> partial trailing row block
        ((4, 8, 14, 14), jnp.bfloat16),  # bf16 inputs, 16-row sublane tiles
    ]
    keys = jax.random.split(key, 2 * len(shapes_dtypes))
    stu = [jax.random.normal(keys[2 * i], sh, dtype=dt)
           for i, (sh, dt) in enumerate(shapes_dtypes)]
    tea = [jax.random.normal(keys[2 * i + 1], sh, dtype=dt)
           for i, (sh, dt) in enumerate(shapes_dtypes)]

    # Force the Pallas path for all pairs so the kernel is actually exercised.
    loss = jax.block_until_ready(cd_loss(stu, tea, min_pallas_bytes=0))
    ref = jax.block_until_ready(_reference(stu, tea))
    assert jnp.allclose(loss, ref, rtol=2e-5, atol=1e-6), (loss, ref)

    # Exercise the multi-col-tile path with a masked ragged trailing block and
    # multiple row tiles, using forced-small tile targets on a small shape:
    # rows=33 -> 5 row tiles (last partial); cols=324 -> 3 col tiles of 128
    # (last has 68 valid columns, masked in-kernel).
    s_m = jax.random.normal(jax.random.PRNGKey(1), (3, 11, 18, 18), jnp.float32)
    t_m = jax.random.normal(jax.random.PRNGKey(2), (3, 11, 18, 18), jnp.float32)
    got = jax.block_until_ready(
        cd_loss_pair_pallas(s_m, t_m, tr_target=8, tc_target=128))
    want = jax.block_until_ready(_cd_loss_pair_ref(s_m, t_m))
    assert jnp.allclose(got, want, rtol=2e-5, atol=1e-6), (got, want)

    # Default size-thresholded path (JAX fallback for these tiny pairs).
    loss_auto = jax.block_until_ready(cd_loss(stu, tea))
    assert jnp.allclose(loss_auto, ref, rtol=2e-5, atol=1e-6), (loss_auto, ref)

    print("KERNEL_OK")
</pallas_src>

<mosaic_0001>
module attributes {stable_mosaic.version = 11 : i64} {
  func.func @_cd_pair_kernel(%arg0: i32, %arg1: i32, %arg2: memref<8x256xf32, #tpu.memory_space<vmem>>, %arg3: memref<8x256xf32, #tpu.memory_space<vmem>>, %arg4: memref<8x128xf32, #tpu.memory_space<vmem>>) attributes {dimension_semantics = [#tpu.dimension_semantics<parallel>, #tpu.dimension_semantics<arbitrary>], iteration_bounds = array<i64: 1, 1>, scalar_prefetch = 0 : i64, scratch_operands = 0 : i64, tpu.core_type = #tpu.core_type<tc>, window_params = [{transform_indices = @transform_0, window_bounds = array<i64: 8, 256>}, {transform_indices = @transform_1, window_bounds = array<i64: 8, 256>}, {transform_indices = @transform_2, window_bounds = array<i64: 8, 128>}]} {
    %c0_i32 = arith.constant 0 : i32
    %0 = arith.cmpi eq, %arg1, %c0_i32 : i32
    %1 = arith.extui %0 : i1 to i32
    %c0_i32_0 = arith.constant 0 : i32
    %2 = arith.cmpi ne, %1, %c0_i32_0 : i32
    scf.if %2 {
      %cst = arith.constant 0.000000e+00 : f32
      %12 = vector.broadcast %cst : f32 to vector<8x128xf32>
      %c0_8 = arith.constant 0 : index
      %c0_9 = arith.constant 0 : index
      %13 = vector.load %arg4[%c0_8, %c0_9] : memref<8x128xf32, #tpu.memory_space<vmem>>, vector<8x128xf32>
      tpu.vector_store %arg4[%c0_8, %c0_9], %12 {strides = array<i32>} : memref<8x128xf32, #tpu.memory_space<vmem>>, vector<8x128xf32>,
    } else {
    }
    %c0 = arith.constant 0 : index
    %c0_1 = arith.constant 0 : index
    %3 = vector.load %arg2[%c0, %c0_1] : memref<8x256xf32, #tpu.memory_space<vmem>>, vector<8x256xf32>
    %c0_2 = arith.constant 0 : index
    %c0_3 = arith.constant 0 : index
    %4 = vector.load %arg3[%c0_2, %c0_3] : memref<8x256xf32, #tpu.memory_space<vmem>>, vector<8x256xf32>
    %5 = arith.subf %3, %4 : vector<8x256xf32>
    %6 = vector.extract_strided_slice %5 {offsets = [0, 0], sizes = [8, 128], strides = [1, 1]} : vector<8x256xf32> to vector<8x128xf32>
    %7 = vector.extract_strided_slice %5 {offsets = [0, 128], sizes = [8, 128], strides = [1, 1]} : vector<8x256xf32> to vector<8x128xf32>
    %8 = arith.addf %6, %7 : vector<8x128xf32>
    %c0_4 = arith.constant 0 : index
    %c0_5 = arith.constant 0 : index
    %9 = vector.load %arg4[%c0_4, %c0_5] : memref<8x128xf32, #tpu.memory_space<vmem>>, vector<8x128xf32>
    %10 = arith.addf %9, %8 : vector<8x128xf32>
    %c0_6 = arith.constant 0 : index
    %c0_7 = arith.constant 0 : index
    %11 = vector.load %arg4[%c0_6, %c0_7] : memref<8x128xf32, #tpu.memory_space<vmem>>, vector<8x128xf32>
    tpu.vector_store %arg4[%c0_6, %c0_7], %10 {strides = array<i32>} : memref<8x128xf32, #tpu.memory_space<vmem>>, vector<8x128xf32>,
    return
  }
  func.func @transform_0(%arg0: i32, %arg1: i32) -> (i32, i32) {
    %c0_i32 = arith.constant 0 : i32
    return %arg0, %arg1 : i32, i32
  }
  func.func @transform_1(%arg0: i32, %arg1: i32) -> (i32, i32) {
    %c0_i32 = arith.constant 0 : i32
    return %arg0, %arg1 : i32, i32
  }
  func.func @transform_2(%arg0: i32, %arg1: i32) -> (i32, i32) {
    %c0_i32 = arith.constant 0 : i32
    %c0_i32_0 = arith.constant 0 : i32
    return %arg0, %c0_i32 : i32, i32
  }
}

</mosaic_0001>

<bundles_post_ra>
// kernel: tpu_custom_call.1
= control target key start
LH: loop header
LB: loop body
LE: loop exit
PB: predicated region body
PF: predicated region fallthrough
CT: control target
= control target key end

     0   :  { %7 = vsyncpa [#allocation3], 0  ;;  %s182_s0 = inlined_call_operand.hbm [shape: f32[8,256], index: 0, kind: input, shape index: {}]   ;;  %s183_s1 = inlined_call_operand.hbm [shape: f32[8,256], index: 1, kind: input, shape index: {}]   ;;  %s184_s2 = inlined_call_operand.hbm [shape: f32[8,128], index: 2, kind: output, shape index: {}]  }
   0x1   :  { %8 = vsyncpa [#allocation6], 0 }
   0x2   :  { %9 = vsyncpa [#allocation4], 0  ;;  %s15_s11 = sshll.u32 %s182_s0, 4  ;;  %s155_s12 = smov [#allocation2]   ;;  %s16_s11 = int_to_ptr.hbm [resolvable:$true] %s15_s11 }
   0x3   :  { %s17_s13 = sshll.u32 %s155_s12, 4  ;;  %s26_s16 = sshll.u32 %s183_s1, 4  ;;  %s18_s13 = int_to_ptr.vmem [resolvable:$true] %s17_s13  ;;  %s27_s16 = int_to_ptr.hbm [resolvable:$true] %s26_s16 }
   0x4   :  { %20 = dma.hbm_to_vmem [thread:$0]  %s16_s11, 256, %s18_s13, [#allocation3]  }
   0x5   :  { %s156_s17 = smov [#allocation5]  }
   0x6   :  { %s28_s18 = sshll.u32 %s156_s17, 4  ;;  %s29_s18 = int_to_ptr.vmem [resolvable:$true] %s28_s18 }
   0x7   :  { %31 = dma.hbm_to_vmem [thread:$0]  %s27_s16, 256, %s29_s18, [#allocation6]  }
   0x8   :  { %149 = dma.done.wait [#allocation3], 256  }
   0x9   :  { %150 = vsyncadd [#allocation3], 4294967040 }
   0xa   :  { %151 = dma.done.wait [#allocation6], 256  }
   0xb   :  { %152 = vsyncadd [#allocation6], 4294967040  ;;  %v45_v0 = vld [vmem:[#allocation2] sm:$0xff]  ;;  %v46_v1 = vld [vmem:[#allocation2 + $0x8] sm:$0xff]  ;;  %s157_s0 = smov [#allocation7]   ;;  %s62_s21 = sshll.u32 %s184_s2, 4  ;;  %s63_s21 = int_to_ptr.hbm [resolvable:$true] %s62_s21 }
   0xc   :  { %v47_v2 = vld [vmem:[#allocation5] sm:$0xff]  ;;  %v48_v3 = vld [vmem:[#allocation5 + $0x8] sm:$0xff]  ;;  %s60_s19 = sshll.u32 %s157_s0, 4  ;;  %s61_s19 = int_to_ptr.vmem [resolvable:$true] %s60_s19 }
   0xd   :  { %v49_v4 = vsub.f32 %v45_v0, %v47_v2  ;;  %v50_v5 = vsub.f32 %v46_v1, %v48_v3 }
   0xf   :  { %v51_v6 = vadd.f32 %v50_v5, %v49_v4 }
  0x11   :  { %54 = vst [vmem:[#allocation7] sm:$0xff] %v51_v6 }
  0x12   :  { %65 = dma.vmem_to_hbm [thread:$0]  %s61_s19, 128, %s63_s21, [#allocation4]  }
  0x13   :  { %153 = dma.done.wait [#allocation4], 128  }
  0x14   :  { %154 = vsyncadd [#allocation4], 4294967168 }
  0x15   :  { %70 = vsyncpa [#allocation3], 1 }
  0x16   :  { %71 = vsyncpa [#allocation6], 1 }
  0x17   :  { %72 = vsyncpa [#allocation4], 1 }

</bundles_post_ra>
